<compile_context>
chip_gen: v5e
topology: v5e:2x2
jax: 0.10.0
libtpu: 0.0.40
codegen_flags: <defaults>
</compile_context>

<pallas_src>
import math

import jax
import jax.numpy as jnp
from jax.experimental import pallas as pl
from jax.experimental.pallas import tpu as pltpu

_EPS = 1e-15  # same clamp geoopt uses inside arcosh / the denominator


def _make_logmap0_kernel(d, groups):
    """Kernel for z packed as (rows, groups*d) -> out (rows, groups*(d-1)).

    Each 128-lane-multiple output row holds `groups` consecutive logical rows
    of the (d-1)-wide result; the per-group un-interleave happens in-register
    (XLU slot), so HBM sees one dense read + one dense write per tile.
    """

    def kernel(z_ref, o_ref):
        z = z_ref[...].astype(jnp.float32)  # (TR, groups*d), in-vreg upcast

        # Hoisted transcendental chain, applied elementwise to the WHOLE tile:
        # EUP cost is per-vreg, so this is 2 pushes per vreg (rsqrt + log)
        # instead of 3 pushes per group on (TR,1) columns.  Non-time lanes
        # compute values that are simply never read.
        a = jnp.maximum(z, 1.0)                        # valid points have z0 >= 1
        d2 = jnp.maximum((a - 1.0) * (a + 1.0), _EPS)  # better conditioned near a=1
        r = jax.lax.rsqrt(d2)                          # EUP push #1
        # arcosh(a) = log(a + sqrt(a^2-1)); sqrt(d2) = d2 * r (VALU mul, saves
        # an EUP push).  scale -> 1 as a -> 1 (eps clamp keeps it finite).
        scale = jnp.log(a + d2 * r) * r                # EUP push #2

        parts = []
        for gi in range(groups):                       # small static unrolled loop
            s = scale[:, gi * d:gi * d + 1]            # (TR,1) time-lane scale
            parts.append(s * z[:, gi * d + 1:(gi + 1) * d])   # (TR, d-1)
        out = parts[0] if groups == 1 else jnp.concatenate(parts, axis=-1)
        o_ref[...] = out.astype(o_ref.dtype)           # single dense lane-aligned store

    return kernel


def _round_up(x, m):
    return ((x + m - 1) // m) * m


def log_layer(z, *, row_tile=None):
    """z: (..., D) points on the Lorentz hyperboloid (k=1).
    Returns logmap0(z)[..., 1:] with shape (..., D-1), same dtype as z."""
    *lead, d = z.shape
    rows = 1
    for s in lead:
        rows *= s
    dm1 = d - 1

    # Lane-dense packing: pack g logical rows per output row so that the output
    # last dim g*(d-1) is a multiple of 128 (unmasked full-width stores).
    if dm1 % 128 == 0:
        g = 1
    else:
        g = 128 // math.gcd(dm1, 128)     # power of two; g*(d-1) % 128 == 0
        while g > 1 and rows % g != 0:    # largest pow-2 divisor that divides rows
            g //= 2                       # (even g=2 halves masked-store waste)

    packed_rows = rows // g
    zf = z.reshape(packed_rows, g * d)    # contiguous reshape: no extra HBM pass

    itemsize = jnp.dtype(z.dtype).itemsize
    in_lanes = _round_up(g * d, 128)      # VMEM lane padding of the input tile
    out_lanes = _round_up(g * dm1, 128)

    if row_tile is None:
        # Target ~4 MiB of (in + out) traffic per grid step; double-buffered
        # ~8 MiB VMEM — fits v5e's 16 MiB scoped default, v6e's 32 MiB, and
        # v7x's 32 MiB.  16-bit inputs automatically get ~2x the rows.
        budget = 4 * 1024 * 1024
        rt = budget // ((in_lanes + out_lanes) * itemsize)
        rt = max(8, (rt // 8) * 8)
        # Keep >= 2 grid steps on reasonably sized inputs so v7x's "parallel"
        # axis can be split across its 2 TensorCores.
        if packed_rows >= 4096:
            rt = min(rt, _round_up(pl.cdiv(packed_rows, 2), 8))
    else:
        rt = max(8, (row_tile // 8) * 8)
    rt = min(rt, _round_up(packed_rows, 8))

    grid = (pl.cdiv(packed_rows, rt),)

    # Padded rows of the last partial block read unspecified data, but the
    # alpha clamp keeps the math finite and the partial-block writeback is
    # masked, so they never reach the output.
    out = pl.pallas_call(
        _make_logmap0_kernel(d, g),
        out_shape=jax.ShapeDtypeStruct((packed_rows, g * dm1), z.dtype),
        grid=grid,
        in_specs=[pl.BlockSpec((rt, g * d), lambda i: (i, 0))],
        out_specs=pl.BlockSpec((rt, g * dm1), lambda i: (i, 0)),
        compiler_params=pltpu.CompilerParams(
            dimension_semantics=("parallel",),  # lets v7x shard steps across 2 TCs
        ),
        cost_estimate=pl.CostEstimate(
            flops=10 * rows * d,
            transcendentals=2 * rows * d,       # log + rsqrt issued per element
            bytes_accessed=rows * (2 * d - 1) * itemsize,
        ),
    )(zf)
    return out.reshape(*lead, dm1)


def _log_layer_ref(z):
    """Pure-JAX reference of geoopt Lorentz(k=1).logmap0(z)[..., 1:]."""
    alpha = jnp.maximum(z[..., :1].astype(jnp.float32), 1.0)
    d2 = jnp.maximum(alpha * alpha - 1.0, _EPS)
    scale = jnp.arccosh(alpha) / jnp.sqrt(d2)
    return (scale * z[..., 1:].astype(jnp.float32)).astype(z.dtype)


if __name__ == "__main__":
    key = jax.random.PRNGKey(0)
    B, S, D = 2, 8, 33  # ambient Lorentz dim: 1 time + 32 spatial coordinates

    # Points that actually lie on the k=1 hyperboloid: z0 = sqrt(1 + ||z_s||^2)
    spatial = 0.5 * jax.random.normal(key, (B, S, D - 1), dtype=jnp.float32)
    time = jnp.sqrt(1.0 + jnp.sum(spatial * spatial, axis=-1, keepdims=True))
    z = jnp.concatenate([time, spatial], axis=-1)  # (2, 8, 33)

    out = log_layer(z)
    jax.block_until_ready(out)

    ref = _log_layer_ref(z)
    assert out.shape == (B, S, D - 1), out.shape
    assert out.dtype == z.dtype, out.dtype
    assert jnp.allclose(out, ref, atol=1e-5, rtol=1e-5), float(
        jnp.max(jnp.abs(out - ref))
    )
    print("KERNEL_OK")
</pallas_src>

<mosaic_0001>
module attributes {stable_mosaic.version = 11 : i64} {
  func.func @kernel(%arg0: i32, %arg1: memref<8x132xf32, #tpu.memory_space<vmem>>, %arg2: memref<8x128xf32, #tpu.memory_space<vmem>>) attributes {dimension_semantics = [#tpu.dimension_semantics<parallel>], iteration_bounds = array<i64: 1>, scalar_prefetch = 0 : i64, scratch_operands = 0 : i64, tpu.core_type = #tpu.core_type<tc>, window_params = [{transform_indices = @transform_0, window_bounds = array<i64: 8, 132>}, {transform_indices = @transform_1, window_bounds = array<i64: 8, 128>}]} {
    %c0 = arith.constant 0 : index
    %c0_0 = arith.constant 0 : index
    %0 = vector.load %arg1[%c0, %c0_0] : memref<8x132xf32, #tpu.memory_space<vmem>>, vector<8x132xf32>
    %cst = arith.constant 1.000000e+00 : f32
    %1 = vector.broadcast %cst : f32 to vector<8x132xf32>
    %2 = arith.maximumf %0, %1 : vector<8x132xf32>
    %cst_1 = arith.constant 1.000000e+00 : f32
    %3 = vector.broadcast %cst_1 : f32 to vector<8x132xf32>
    %4 = arith.subf %2, %3 : vector<8x132xf32>
    %cst_2 = arith.constant 1.000000e+00 : f32
    %5 = vector.broadcast %cst_2 : f32 to vector<8x132xf32>
    %6 = arith.addf %2, %5 : vector<8x132xf32>
    %7 = arith.mulf %4, %6 : vector<8x132xf32>
    %cst_3 = arith.constant 1.000000e-15 : f32
    %8 = vector.broadcast %cst_3 : f32 to vector<8x132xf32>
    %9 = arith.maximumf %7, %8 : vector<8x132xf32>
    %10 = math.rsqrt %9 : vector<8x132xf32>
    %11 = arith.mulf %9, %10 : vector<8x132xf32>
    %12 = arith.addf %2, %11 : vector<8x132xf32>
    %13 = math.log %12 : vector<8x132xf32>
    %14 = arith.mulf %13, %10 : vector<8x132xf32>
    %15 = vector.extract_strided_slice %14 {offsets = [0, 0], sizes = [8, 1], strides = [1, 1]} : vector<8x132xf32> to vector<8x1xf32>
    %16 = vector.extract_strided_slice %0 {offsets = [0, 1], sizes = [8, 32], strides = [1, 1]} : vector<8x132xf32> to vector<8x32xf32>
    %17 = vector.broadcast %15 : vector<8x1xf32> to vector<8x32xf32>
    %18 = arith.mulf %17, %16 : vector<8x32xf32>
    %19 = vector.extract_strided_slice %14 {offsets = [0, 33], sizes = [8, 1], strides = [1, 1]} : vector<8x132xf32> to vector<8x1xf32>
    %20 = vector.extract_strided_slice %0 {offsets = [0, 34], sizes = [8, 32], strides = [1, 1]} : vector<8x132xf32> to vector<8x32xf32>
    %21 = vector.broadcast %19 : vector<8x1xf32> to vector<8x32xf32>
    %22 = arith.mulf %21, %20 : vector<8x32xf32>
    %23 = vector.extract_strided_slice %14 {offsets = [0, 66], sizes = [8, 1], strides = [1, 1]} : vector<8x132xf32> to vector<8x1xf32>
    %24 = vector.extract_strided_slice %0 {offsets = [0, 67], sizes = [8, 32], strides = [1, 1]} : vector<8x132xf32> to vector<8x32xf32>
    %25 = vector.broadcast %23 : vector<8x1xf32> to vector<8x32xf32>
    %26 = arith.mulf %25, %24 : vector<8x32xf32>
    %27 = vector.extract_strided_slice %14 {offsets = [0, 99], sizes = [8, 1], strides = [1, 1]} : vector<8x132xf32> to vector<8x1xf32>
    %28 = vector.extract_strided_slice %0 {offsets = [0, 100], sizes = [8, 32], strides = [1, 1]} : vector<8x132xf32> to vector<8x32xf32>
    %29 = vector.broadcast %27 : vector<8x1xf32> to vector<8x32xf32>
    %30 = arith.mulf %29, %28 : vector<8x32xf32>
    %31 = tpu.concatenate %18, %22, %26, %30 in 1 : vector<8x32xf32>, vector<8x32xf32>, vector<8x32xf32>, vector<8x32xf32> -> vector<8x128xf32>
    %c0_4 = arith.constant 0 : index
    %c0_5 = arith.constant 0 : index
    %32 = vector.load %arg2[%c0_4, %c0_5] : memref<8x128xf32, #tpu.memory_space<vmem>>, vector<8x128xf32>
    tpu.vector_store %arg2[%c0_4, %c0_5], %31 {strides = array<i32>} : memref<8x128xf32, #tpu.memory_space<vmem>>, vector<8x128xf32>,
    return
  }
  func.func @transform_0(%arg0: i32) -> (i32, i32) {
    %c0_i32 = arith.constant 0 : i32
    %c0_i32_0 = arith.constant 0 : i32
    return %arg0, %c0_i32 : i32, i32
  }
  func.func @transform_1(%arg0: i32) -> (i32, i32) {
    %c0_i32 = arith.constant 0 : i32
    %c0_i32_0 = arith.constant 0 : i32
    return %arg0, %c0_i32 : i32, i32
  }
}

</mosaic_0001>

<bundles_post_ra>
// kernel: tpu_custom_call.1
= control target key start
LH: loop header
LB: loop body
LE: loop exit
PB: predicated region body
PF: predicated region fallthrough
CT: control target
= control target key end

     0   :  { %6 = vsyncpa [#allocation3], 0  ;;  %s335_s0 = inlined_call_operand.hbm [shape: f32[4,132], index: 0, kind: input, shape index: {}]   ;;  %s336_s1 = inlined_call_operand.hbm [shape: f32[4,128], index: 1, kind: output, shape index: {}]  }
   0x1   :  { %7 = vsyncpa [#allocation4], 0 }
   0x2   :  { %11 = vsyncadd [#allocation3], 128  ;;  %s12_s8 = sshll.u32 %s335_s0, 4  ;;  %s290_s9 = smov [#allocation2]   ;;  %s13_s8 = int_to_ptr.hbm [resolvable:$true] %s12_s8 }
   0x3   :  { %s14_s10 = sshll.u32 %s290_s9, 4  ;;  %s291_s11 = smov 128   ;;  %s15_s10 = int_to_ptr.vmem [resolvable:$true] %s14_s10 }
   0x4   :  { %s292_s12 = smov 8  }
   0x5   :  { %20 = dma.hbm_to_vmem [thread:$0]  %s13_s8, 128, %s15_s10, [#allocation3], %s291_s11, %s291_s11, %s292_s12  }
   0x6   :  { %286 = dma.done.wait [#allocation3], 256  }
   0x7   :  { %287 = vsyncadd [#allocation3], 4294967040  ;;  %v293_v0 = vmov 33   ;;  %v294_v1 = vmov 0   ;;  %v318_v2 = vld [vmem:[#allocation2] sm:$0xff]  ;;  %v320_v3 = vld [vmem:[#allocation2 + $0x8] sm:$0xff] }
   0x8   :  { %226 = vset.pattern.permute.xlu1 %v293_v0  ;;  %225 = vset.pattern.permute.xlu0 %v294_v1  ;;  %v27_v4 = vmax.f32 %v318_v2, 1.0  ;;  %v28_v5 = vmax.f32 %v320_v3, 1.0  ;;  %v295_v20 = vmov 66   ;;  %v296_v39 = vmov 99   ;;  %s298_s0 = smov 127   ;;  %s299_s13 = smov 126  }
   0x9   :  { %227 = vset.pattern.permute.xlu2 %v295_v20  ;;  %v297_v40 = vmov 839922192   ;;  %s300_s14 = smov 125   ;;  %s301_s15 = smov 124   ;;  %vm182_vm6 = vcmask 261120   ;;  %vm184_vm7 = vcmask 523264  }
   0xa   :  { %v208_v6 = vadd.f32 -1.0, %v27_v4  ;;  %v31_v7 = vadd.f32 1.0, %v27_v4  ;;  %v209_v8 = vadd.f32 -1.0, %v28_v5  ;;  %v32_v9 = vadd.f32 1.0, %v28_v5 }
   0xb   :  { %v73_v41 = vunpack.c.l.s4 %v297_v40  ;;  %vm179_vm8 = vcmask 1014784   ;;  %vm186_vm9 = vcmask 785408  }
   0xc   :  { %v33_v10 = vmul.f32 %v208_v6, %v31_v7  ;;  %v34_v11 = vmul.f32 %v209_v8, %v32_v9 }
   0xd   :  { %v74_v42 = vunpack.c.0.s8 %v73_v41 }
   0xe   :  { %v35_v12 = vmax.f32 %v33_v10, 1e-15  ;;  %v36_v13 = vmax.f32 %v34_v11, 1e-15 }
  0x10   :  { %230 = vrsqrt.f32 %v35_v12  ;;  %vm43_vm0 = vweird.f32 %v35_v12  ;;  %vm53_vm2 = vweird.f32 %v36_v13 }
  0x11   :  { %232 = vrsqrt.f32 %v36_v13 }
  0x16   :  { %v231_v14 = vpop.eup %230 }
  0x17   :  { %v233_v15 = vpop.eup %232  ;;  %v38_v16 = vmul.f32 %v231_v14, %v35_v12  ;;  %vm44_vm1 = vweird.f32 %v231_v14 }
  0x18   :  { %v48_v17 = vmul.f32 %v233_v15, %v36_v13  ;;  %vm54_vm3 = vweird.f32 %v233_v15  ;;  %vm45_vm4 = vmor %vm43_vm0, %vm44_vm1 }
  0x19   :  { %v39_v18 = vmul.f32 %v231_v14, %v38_v16  ;;  %vm55_vm5 = vmor %vm53_vm2, %vm54_vm3 }
  0x1a   :  { %v49_v19 = vmul.f32 %v233_v15, %v48_v17 }
  0x1b   :  { %v40_v21 = vmul.f32 0.5, %v39_v18 }
  0x1c   :  { %v50_v22 = vmul.f32 0.5, %v49_v19 }
  0x1d   :  { %v41_v23 = vsub.f32 1.5, %v40_v21 }
  0x1e   :  { %v51_v24 = vsub.f32 1.5, %v50_v22 }
  0x1f   :  { %v42_v25 = vmul.f32 %v231_v14, %v41_v23 }
  0x20   :  { %v52_v26 = vmul.f32 %v233_v15, %v51_v24 }
  0x21   :  { %v46_v27 = vsel %vm45_vm4, %v231_v14, %v42_v25 }
  0x22   :  { %v57_v28 = vmul.f32 %v46_v27, %v35_v12  ;;  %v56_v29 = vsel %vm55_vm5, %v233_v15, %v52_v26 }
  0x23   :  { %v58_v30 = vmul.f32 %v56_v29, %v36_v13 }
  0x24   :  { %v59_v31 = vadd.f32 %v57_v28, %v27_v4 }
  0x25   :  { %v60_v32 = vadd.f32 %v58_v30, %v28_v5 }
  0x26   :  { %234 = vlog2.f32 %v59_v31 }
  0x27   :  { %236 = vlog2.f32 %v60_v32 }
  0x2c   :  { %v235_v33 = vpop.eup %234 }
  0x2d   :  { %v62_v34 = vmul.f32 0.6931472, %v235_v33  ;;  %v237_v35 = vpop.eup %236 }
  0x2e   :  { %v64_v37 = vmul.f32 0.6931472, %v237_v35 }
  0x2f   :  { %v65_v36 = vmul.f32 %v62_v34, %v46_v27 }
  0x30   :  { %v66_v38 = vmul.f32 %v64_v37, %v56_v29 }
  0x31   :  { %88 = vperm.xlu1 %226, %v65_v36   ;;  %69 = vperm.xlu0 %225, %v65_v36  }
  0x32   :  { %106 = vperm.xlu2 %227, %v65_v36  }
  0x39   :  { %96 = vperm.xlu1 %226, %v66_v38   ;;  %78 = vperm.xlu0 %225, %v66_v38  }
  0x3a   :  { %114 = vperm.xlu2 %227, %v66_v38  }
  0x41   :  { %229 = vset.pattern.permute.xlu1 %v296_v39  ;;  %228 = vset.pattern.permute.xlu0 %v296_v39 }
  0x42   :  { %132 = vperm.xlu1 %229, %v66_v38   ;;  %124 = vperm.xlu0 %228, %v65_v36  }
  0x8c   :  { %v107_v50 = vpop.permute.xlu2 %106 }
  0x8d   :  { %v112_v58 = vperm.slane %v107_v50, %v74_v42 }
  0x8f   :  { %v121_v60 = vmul.f32 %v112_v58, %v318_v2 }
  0x94   :  { %v115_v57 = vpop.permute.xlu2 %114 }
  0x95   :  { %v120_v59 = vperm.slane %v115_v57, %v74_v42 }
  0x97   :  { %v122_v62 = vmul.f32 %v120_v59, %v320_v3 }
  0xa3   :  { %v70_v43 = vpop.permute.xlu0 %69  ;;  %v89_v45 = vpop.permute.xlu1 %88 }
  0xa4   :  { %v75_v44 = vperm.slane %v70_v43, %v74_v42  ;;  %v94_v53 = vperm.slane %v89_v45, %v74_v42 }
  0xa6   :  { %v85_v46 = vmul.f32 %v75_v44, %v318_v2  ;;  %v103_v55 = vmul.f32 %v94_v53, %v318_v2 }
  0xa8   :  { %143 = vst [vmem:[#allocation1] ss:$2 sm:$0xff] %v85_v46 }
  0xab   :  { %v79_v47 = vpop.permute.xlu0 %78  ;;  %v97_v51 = vpop.permute.xlu1 %96 }
  0xac   :  { %v84_v48 = vperm.slane %v79_v47, %v74_v42  ;;  %v102_v52 = vperm.slane %v97_v51, %v74_v42 }
  0xae   :  { %v86_v49 = vmul.f32 %v84_v48, %v320_v3  ;;  %v104_v54 = vmul.f32 %v102_v52, %v320_v3 }
  0xb0   :  { %145 = vst [vmem:[#allocation1 + $0x1] ss:$2 sm:$0xff] %v86_v49 }
  0xb4   :  { %v125_v61 = vpop.permute.xlu0 %124  ;;  %v133_v0 = vpop.permute.xlu1 %132 }
  0xb5   :  { %v130_v1 = vperm.slane %v125_v61, %v74_v42  ;;  %v138_v4 = vperm.slane %v133_v0, %v74_v42 }
  0xb7   :  { %v146_v56 = vld.sshfl [vmem:[#allocation1] sm:$0xff pattern:$0x75316420]  ;;  %v139_v5 = vmul.f32 %v130_v1, %v318_v2  ;;  %v140_v6 = vmul.f32 %v138_v4, %v320_v3 }
  0xb8   :  { %154 = vst [vmem:[#allocation1 + $0x1] ss:$2 sm:$0xff] %v104_v54  ;;  %147 = vrot.lane.b32.xlu2 %v146_v56, %s298_s0 }
  0xb9   :  { %152 = vst [vmem:[#allocation1] ss:$2 sm:$0xff] %v103_v55 }
  0xc0   :  { %v155_v63 = vld.sshfl [vmem:[#allocation1] sm:$0xff pattern:$0x75316420] }
  0xc1   :  { %156 = vrot.lane.b32.xlu1 %v155_v63, %s299_s13  ;;  %161 = vst [vmem:[#allocation1] ss:$2 sm:$0xff] %v121_v60 }
  0xc2   :  { %163 = vst [vmem:[#allocation1 + $0x1] ss:$2 sm:$0xff] %v122_v62 }
  0xc9   :  { %v164_v7 = vld.sshfl [vmem:[#allocation1] sm:$0xff pattern:$0x75316420] }
  0xca   :  { %165 = vrot.lane.b32.xlu2 %v164_v7, %s300_s14  ;;  %170 = vst [vmem:[#allocation1] ss:$2 sm:$0xff] %v139_v5 }
  0xcb   :  { %172 = vst [vmem:[#allocation1 + $0x1] ss:$2 sm:$0xff] %v140_v6 }
  0xd2   :  { %v174_v8 = vld.sshfl [vmem:[#allocation1 + $0x8] sm:$0xff pattern:$0x75316420]  ;;  %v173_v9 = vld.sshfl [vmem:[#allocation1] sm:$0xff pattern:$0x75316420] }
  0xd3   :  { %177 = vrot.lane.b32.xlu1 %v174_v8, %s301_s15  ;;  %175 = vrot.lane.b32.xlu0 %v173_v9, %s301_s15 }
 0x112   :  { %v148_v10 = vpop.permute.xlu2 %147 }
 0x124   :  { %v166_v13 = vpop.permute.xlu2 %165 }
 0x133   :  { %v157_v11 = vpop.permute.xlu1 %156 }
 0x134   :  { %v183_v12 = vsel %vm182_vm6, %v148_v10, %v157_v11 }
 0x135   :  { %v185_v14 = vsel %vm184_vm7, %v183_v12, %v166_v13 }
 0x145   :  { %v178_v2 = vpop.permute.xlu1 %177  ;;  %v176_v3 = vpop.permute.xlu0 %175 }
 0x146   :  { %v180_v15 = vsel %vm179_vm8, %v176_v3, %v178_v2 }
 0x147   :  { %v187_v16 = vsel %vm186_vm9, %v185_v14, %v180_v15 }
 0x148   :  { %188 = vst [vmem:[#allocation5] sm:$0xff] %v187_v16 }
 0x149   :  { %192 = vsyncadd [#allocation4], 64  ;;  %s195_s18 = sshll.u32 %s336_s1, 4  ;;  %s302_s19 = smov [#allocation5]   ;;  %s196_s18 = int_to_ptr.hbm [resolvable:$true] %s195_s18 }
 0x14a   :  { %s193_s20 = sshll.u32 %s302_s19, 4  ;;  %s303_s21 = smov 64   ;;  %s194_s20 = int_to_ptr.vmem [resolvable:$true] %s193_s20 }
 0x14b   :  { %s304_s22 = smov 4  }
 0x14c   :  { %201 = dma.vmem_to_hbm [thread:$0]  %s194_s20, 64, %s196_s18, [#allocation4], %s303_s21, %s303_s21, %s304_s22  }
 0x14d   :  { %288 = dma.done.wait [#allocation4], 128  }
 0x14e   :  { %289 = vsyncadd [#allocation4], 4294967168 }
 0x14f   :  { %206 = vsyncpa [#allocation3], 1 }
 0x150   :  { %207 = vsyncpa [#allocation4], 1 }

</bundles_post_ra>
